<compile_context>
chip_gen: v6e
topology: v6e:2x2x1
jax: 0.10.0
libtpu: 0.0.40
codegen_flags: <defaults>
</compile_context>

<pallas_src>
import functools

import jax
import jax.numpy as jnp
from jax.experimental import pallas as pl
from jax.experimental.pallas import tpu as pltpu

INPUT_SIZE = 784
HIDDEN_SIZE = 500
NUM_CLASSES = 10

HIDDEN_PAD = 512   # 500 -> 512: multiple of 128 lanes (zero-padded, exact)
OUT_PAD = 128      # 10  -> 128: lane-dense output stores (zero-padded, exact)


def _round_up(x, m):
    return (x + m - 1) // m * m


def mlp_kernel(x_ref, w1_ref, b1_ref, w2_ref, b2_ref, o_ref):
    # fc1: bf16 x @ bf16 W1 on the MXU, f32 accumulation.
    h = jnp.dot(x_ref[...], w1_ref[...], preferred_element_type=jnp.float32)
    # Bias + ReLU epilogue in f32 (v5e VPU has no bf16 ALU path).
    h = jnp.maximum(h + b1_ref[...], 0.0)
    # fc2: down-cast activations to bf16 for the MXU, accumulate in f32.
    out = jnp.dot(h.astype(jnp.bfloat16), w2_ref[...],
                  preferred_element_type=jnp.float32)
    o_ref[...] = (out + b2_ref[...]).astype(o_ref.dtype)


@functools.partial(jax.jit, static_argnames=("tile_b",))
def mlp_forward(x, w1, b1, w2, b2, *, tile_b=256):
    """x: (B, 784) f32. w1: (784, 500), b1: (500,), w2: (500, 10), b2: (10,)."""
    B = x.shape[0]
    b1 = b1.reshape(1, -1).astype(jnp.float32)
    b2 = b2.reshape(1, -1).astype(jnp.float32)

    # ---- wrapper-side layout plumbing (no effect on results) ----
    tile_b = min(tile_b, _round_up(B, 8))          # sublane-aligned batch tile
    B_pad = _round_up(B, tile_b)

    x_p = jnp.zeros((B_pad, INPUT_SIZE), jnp.bfloat16).at[:B].set(
        x.astype(jnp.bfloat16))
    w1_p = jnp.zeros((INPUT_SIZE, HIDDEN_PAD), jnp.bfloat16).at[
        :, :HIDDEN_SIZE].set(w1.astype(jnp.bfloat16))
    b1_p = jnp.zeros((1, HIDDEN_PAD), jnp.float32).at[:, :HIDDEN_SIZE].set(b1)
    w2_p = jnp.zeros((HIDDEN_PAD, OUT_PAD), jnp.bfloat16).at[
        :HIDDEN_SIZE, :NUM_CLASSES].set(w2.astype(jnp.bfloat16))
    b2_p = jnp.zeros((1, OUT_PAD), jnp.float32).at[:, :NUM_CLASSES].set(b2)

    grid = (B_pad // tile_b,)

    flops = 2 * B_pad * (INPUT_SIZE * HIDDEN_PAD + HIDDEN_PAD * OUT_PAD)
    bytes_accessed = (x_p.size * 2 + w1_p.size * 2 + w2_p.size * 2
                      + b1_p.size * 4 + b2_p.size * 4 + B_pad * OUT_PAD * 4)

    out = pl.pallas_call(
        mlp_kernel,
        out_shape=jax.ShapeDtypeStruct((B_pad, OUT_PAD), jnp.float32),
        grid=grid,
        in_specs=[
            pl.BlockSpec((tile_b, INPUT_SIZE), lambda i: (i, 0)),      # streamed
            pl.BlockSpec((INPUT_SIZE, HIDDEN_PAD), lambda i: (0, 0)),  # resident
            pl.BlockSpec((1, HIDDEN_PAD), lambda i: (0, 0)),           # resident
            pl.BlockSpec((HIDDEN_PAD, OUT_PAD), lambda i: (0, 0)),     # resident
            pl.BlockSpec((1, OUT_PAD), lambda i: (0, 0)),              # resident
        ],
        out_specs=pl.BlockSpec((tile_b, OUT_PAD), lambda i: (i, 0)),
        compiler_params=pltpu.CompilerParams(
            dimension_semantics=("parallel",),      # megacore-shardable (v7x)
            vmem_limit_bytes=32 * 1024 * 1024,      # fits v5e/v6e/v7x scoped VMEM
        ),
        cost_estimate=pl.CostEstimate(
            flops=flops, transcendentals=0, bytes_accessed=bytes_accessed),
    )(x_p, w1_p, b1_p, w2_p, b2_p)

    return out[:B, :NUM_CLASSES]


def init_params(key):
    """Deterministic init mimicking PyTorch nn.Linear (uniform +-1/sqrt(fan_in))."""
    k1, k2, k3, k4 = jax.random.split(key, 4)
    bound1 = 1.0 / jnp.sqrt(jnp.float32(INPUT_SIZE))
    bound2 = 1.0 / jnp.sqrt(jnp.float32(HIDDEN_SIZE))
    # Stored as (in, out) — transpose of PyTorch's (out, in).
    w1 = jax.random.uniform(k1, (INPUT_SIZE, HIDDEN_SIZE), jnp.float32, -bound1, bound1)
    b1 = jax.random.uniform(k2, (HIDDEN_SIZE,), jnp.float32, -bound1, bound1)
    w2 = jax.random.uniform(k3, (HIDDEN_SIZE, NUM_CLASSES), jnp.float32, -bound2, bound2)
    b2 = jax.random.uniform(k4, (NUM_CLASSES,), jnp.float32, -bound2, bound2)
    return w1, b1, w2, b2


def reference_forward(x, w1, b1, w2, b2):
    """Pure-JAX reference mirroring the kernel's bf16-input / f32-accum math."""
    h = jnp.dot(x.astype(jnp.bfloat16), w1.astype(jnp.bfloat16),
                preferred_element_type=jnp.float32)
    h = jnp.maximum(h + b1.reshape(1, -1), 0.0)
    out = jnp.dot(h.astype(jnp.bfloat16), w2.astype(jnp.bfloat16),
                  preferred_element_type=jnp.float32)
    return out + b2.reshape(1, -1)


if __name__ == "__main__":
    key = jax.random.PRNGKey(0)
    kx, kp = jax.random.split(key)
    w1, b1, w2, b2 = init_params(kp)

    # Small primary test (single grid step).
    batch = 8
    x = jax.random.normal(kx, (batch, INPUT_SIZE), jnp.float32)
    out = jax.block_until_ready(mlp_forward(x, w1, b1, w2, b2))
    ref = reference_forward(x, w1, b1, w2, b2)
    assert out.shape == (batch, NUM_CLASSES)
    assert jnp.allclose(out, ref, atol=2e-2, rtol=2e-2)

    # Ragged batch + multi-step grid (exercises batch tiling / padding path).
    batch2 = 37
    x2 = jax.random.normal(kx, (batch2, INPUT_SIZE), jnp.float32)
    out2 = jax.block_until_ready(mlp_forward(x2, w1, b1, w2, b2, tile_b=16))
    ref2 = reference_forward(x2, w1, b1, w2, b2)
    assert out2.shape == (batch2, NUM_CLASSES)
    assert jnp.allclose(out2, ref2, atol=2e-2, rtol=2e-2)

    print("KERNEL_OK")
</pallas_src>

<mosaic_0001>
module attributes {stable_mosaic.version = 11 : i64} {
  func.func @mlp_kernel(%arg0: i32, %arg1: memref<8x784xbf16, #tpu.memory_space<vmem>>, %arg2: memref<784x512xbf16, #tpu.memory_space<vmem>>, %arg3: memref<1x512xf32, #tpu.memory_space<vmem>>, %arg4: memref<512x128xbf16, #tpu.memory_space<vmem>>, %arg5: memref<1x128xf32, #tpu.memory_space<vmem>>, %arg6: memref<8x128xf32, #tpu.memory_space<vmem>>) attributes {dimension_semantics = [#tpu.dimension_semantics<parallel>], iteration_bounds = array<i64: 1>, scalar_prefetch = 0 : i64, scratch_operands = 0 : i64, tpu.core_type = #tpu.core_type<tc>, window_params = [{transform_indices = @transform_0, window_bounds = array<i64: 8, 784>}, {pipeline_mode = #tpu.pipeline_mode<synchronous>, transform_indices = @transform_1, window_bounds = array<i64: 784, 512>}, {pipeline_mode = #tpu.pipeline_mode<synchronous>, transform_indices = @transform_2, window_bounds = array<i64: 1, 512>}, {pipeline_mode = #tpu.pipeline_mode<synchronous>, transform_indices = @transform_3, window_bounds = array<i64: 512, 128>}, {pipeline_mode = #tpu.pipeline_mode<synchronous>, transform_indices = @transform_4, window_bounds = array<i64: 1, 128>}, {transform_indices = @transform_5, window_bounds = array<i64: 8, 128>}]} {
    %c0 = arith.constant 0 : index
    %c0_0 = arith.constant 0 : index
    %0 = vector.load %arg1[%c0, %c0_0] : memref<8x784xbf16, #tpu.memory_space<vmem>>, vector<8x784xbf16>
    %c0_1 = arith.constant 0 : index
    %c0_2 = arith.constant 0 : index
    %1 = vector.load %arg2[%c0_1, %c0_2] : memref<784x512xbf16, #tpu.memory_space<vmem>>, vector<784x512xbf16>
    %cst = arith.constant dense<0.000000e+00> : vector<8x512xf32>
    %2 = tpu.matmul %0, %1, %cst {dimension_numbers = #tpu.dot_dimension_numbers<[1], [0], [0], [1], [0, 0, 1, 1], [], []>} : vector<8x784xbf16>, vector<784x512xbf16>, vector<8x512xf32> -> vector<8x512xf32>
    %c0_3 = arith.constant 0 : index
    %c0_4 = arith.constant 0 : index
    %3 = vector.load %arg3[%c0_3, %c0_4] : memref<1x512xf32, #tpu.memory_space<vmem>>, vector<1x512xf32>
    %4 = vector.broadcast %3 : vector<1x512xf32> to vector<8x512xf32>
    %5 = arith.addf %2, %4 : vector<8x512xf32>
    %cst_5 = arith.constant 0.000000e+00 : f32
    %6 = vector.broadcast %cst_5 : f32 to vector<8x512xf32>
    %7 = arith.maximumf %5, %6 : vector<8x512xf32>
    %8 = arith.truncf %7 : vector<8x512xf32> to vector<8x512xbf16>
    %c0_6 = arith.constant 0 : index
    %c0_7 = arith.constant 0 : index
    %9 = vector.load %arg4[%c0_6, %c0_7] : memref<512x128xbf16, #tpu.memory_space<vmem>>, vector<512x128xbf16>
    %cst_8 = arith.constant dense<0.000000e+00> : vector<8x128xf32>
    %10 = tpu.matmul %8, %9, %cst_8 {dimension_numbers = #tpu.dot_dimension_numbers<[1], [0], [0], [1], [0, 0, 1, 1], [], []>} : vector<8x512xbf16>, vector<512x128xbf16>, vector<8x128xf32> -> vector<8x128xf32>
    %c0_9 = arith.constant 0 : index
    %c0_10 = arith.constant 0 : index
    %11 = vector.load %arg5[%c0_9, %c0_10] : memref<1x128xf32, #tpu.memory_space<vmem>>, vector<1x128xf32>
    %12 = vector.broadcast %11 : vector<1x128xf32> to vector<8x128xf32>
    %13 = arith.addf %10, %12 : vector<8x128xf32>
    %c0_11 = arith.constant 0 : index
    %c0_12 = arith.constant 0 : index
    %14 = vector.load %arg6[%c0_11, %c0_12] : memref<8x128xf32, #tpu.memory_space<vmem>>, vector<8x128xf32>
    tpu.vector_store %arg6[%c0_11, %c0_12], %13 {strides = array<i32>} : memref<8x128xf32, #tpu.memory_space<vmem>>, vector<8x128xf32>,
    return
  }
  func.func @transform_0(%arg0: i32) -> (i32, i32) {
    %c0_i32 = arith.constant 0 : i32
    %c0_i32_0 = arith.constant 0 : i32
    return %arg0, %c0_i32 : i32, i32
  }
  func.func @transform_1(%arg0: i32) -> (i32, i32) {
    %c0_i32 = arith.constant 0 : i32
    %c0_i32_0 = arith.constant 0 : i32
    %c0_i32_1 = arith.constant 0 : i32
    return %c0_i32, %c0_i32_0 : i32, i32
  }
  func.func @transform_2(%arg0: i32) -> (i32, i32) {
    %c0_i32 = arith.constant 0 : i32
    %c0_i32_0 = arith.constant 0 : i32
    %c0_i32_1 = arith.constant 0 : i32
    return %c0_i32, %c0_i32_0 : i32, i32
  }
  func.func @transform_3(%arg0: i32) -> (i32, i32) {
    %c0_i32 = arith.constant 0 : i32
    %c0_i32_0 = arith.constant 0 : i32
    %c0_i32_1 = arith.constant 0 : i32
    return %c0_i32, %c0_i32_0 : i32, i32
  }
  func.func @transform_4(%arg0: i32) -> (i32, i32) {
    %c0_i32 = arith.constant 0 : i32
    %c0_i32_0 = arith.constant 0 : i32
    %c0_i32_1 = arith.constant 0 : i32
    return %c0_i32, %c0_i32_0 : i32, i32
  }
  func.func @transform_5(%arg0: i32) -> (i32, i32) {
    %c0_i32 = arith.constant 0 : i32
    %c0_i32_0 = arith.constant 0 : i32
    return %arg0, %c0_i32 : i32, i32
  }
}

</mosaic_0001>

<bundles_post_ra>
// kernel: mlp_forward.1
= control target key start
LH: loop header
LB: loop body
LE: loop exit
PB: predicated region body
PF: predicated region fallthrough
CT: control target
= control target key end

     0   :  { %vm1248_vm0 = vcmask 130048   ;;  %s3360_s0 = inlined_call_operand.vmem [shape: bf16[8,784], index: 0, kind: input, shape index: {}]   ;;  %s3361_s1 = inlined_call_operand.vmem [shape: bf16[784,512], index: 1, kind: input, shape index: {}]   ;;  %s3362_s2 = inlined_call_operand.vmem [shape: f32[1,512], index: 2, kind: input, shape index: {}]   ;;  %s3363_s3 = inlined_call_operand.vmem [shape: bf16[512,128], index: 3, kind: input, shape index: {}]   ;;  %s3364_s4 = inlined_call_operand.vmem [shape: f32[1,128], index: 4, kind: input, shape index: {}]   ;;  %s3365_s5 = inlined_call_operand.hbm [shape: f32[8,128], index: 5, kind: output, shape index: {}]  }
   0x1   :  { %v2230_v0 = vld [vmem:[%s3361_s1 + $0xe4] ss:$16 sps:$4 sm:$0xff]   ;;  %v2234_v2 = vld [vmem:[%s3361_s1 + $0xe0] ss:$16 sps:$4 sm:$0xff]   ;;  %v23_v48 = vld [vmem:[%s3360_s0 + $0x8] sm:$0xff] }
   0x2   :  { %v2232_v1 = vld [vmem:[%s3361_s1 + $0x2e4] ss:$16 sps:$4 sm:$0xff]   ;;  %1252 = vmatprep.subr.bf16.mxu0 %v2230_v0  ;;  %v2235_v3 = vld [vmem:[%s3361_s1 + $0x2e0] ss:$16 sps:$4 sm:$0xff]   ;;  %v2769_v51 = vcombine.high %v23_v48, %v23_v48 }
   0x3   :  { %1293 = vmatprep.subr.bf16.mxu1 %v2232_v1  ;;  %v2236_v4 = vld [vmem:[%s3361_s1 + $0xc4] ss:$16 sps:$4 sm:$0xff]   ;;  %1253 = vmatpush1.bf16.msra.mxu0 %v2234_v2  ;;  %v2240_v6 = vld [vmem:[%s3361_s1 + $0xc0] ss:$16 sps:$4 sm:$0xff]  }
   0x4   :  { %1294 = vmatpush1.bf16.msra.mxu1 %v2235_v3  ;;  %v2238_v5 = vld [vmem:[%s3361_s1 + $0x2c4] ss:$16 sps:$4 sm:$0xff]   ;;  %1254 = vmatprep.subr.bf16.mxu0 %v2236_v4  ;;  %v2241_v7 = vld [vmem:[%s3361_s1 + $0x2c0] ss:$16 sps:$4 sm:$0xff]  }
   0x5   :  { %1295 = vmatprep.subr.bf16.mxu1 %v2238_v5  ;;  %v2242_v8 = vld [vmem:[%s3361_s1 + $0xa4] ss:$16 sps:$4 sm:$0xff]   ;;  %v2246_v10 = vld [vmem:[%s3361_s1 + $0xa0] ss:$16 sps:$4 sm:$0xff]   ;;  %1325 = vmatprep.mubr.bf16.mxu1 %v2769_v51 }
   0x6   :  { %v2244_v9 = vld [vmem:[%s3361_s1 + $0x2a4] ss:$16 sps:$4 sm:$0xff]   ;;  %v2247_v11 = vld [vmem:[%s3361_s1 + $0x2a0] ss:$16 sps:$4 sm:$0xff]  }
   0x7   :  { %1255 = vmatpush1.bf16.msra.mxu0 %v2240_v6  ;;  %v2248_v12 = vld [vmem:[%s3361_s1 + $0x84] ss:$16 sps:$4 sm:$0xff]   ;;  %v2252_v14 = vld [vmem:[%s3361_s1 + $0x80] ss:$16 sps:$4 sm:$0xff]  }
   0x8   :  { %1296 = vmatpush1.bf16.msra.mxu1 %v2241_v7  ;;  %1256 = vmatprep.subr.bf16.mxu0 %v2242_v8  ;;  %v2250_v13 = vld [vmem:[%s3361_s1 + $0x284] ss:$16 sps:$4 sm:$0xff]   ;;  %v2253_v15 = vld [vmem:[%s3361_s1 + $0x280] ss:$16 sps:$4 sm:$0xff]   ;;  %v2829_v7 = vcombine.low %v23_v48, %v23_v48  ;;  %v2390_v48 = vld [vmem:[%s3361_s1 + $0x1ec] ss:$16 sps:$4 sm:$0xff]  }
   0x9   :  { %1297 = vmatprep.subr.bf16.mxu1 %v2244_v9  ;;  %v2254_v16 = vld [vmem:[%s3361_s1 + $0x64] ss:$16 sps:$4 sm:$0xff]   ;;  %v2258_v18 = vld [vmem:[%s3361_s1 + $0x60] ss:$16 sps:$4 sm:$0xff]  }
   0xa   :  { %v2256_v17 = vld [vmem:[%s3361_s1 + $0x264] ss:$16 sps:$4 sm:$0xff]   ;;  %v2259_v19 = vld [vmem:[%s3361_s1 + $0x260] ss:$16 sps:$4 sm:$0xff]  }
   0xb   :  { %1257 = vmatpush1.bf16.msra.mxu0 %v2246_v10  ;;  %v2260_v20 = vld [vmem:[%s3361_s1 + $0x44] ss:$16 sps:$4 sm:$0xff]   ;;  %v2264_v22 = vld [vmem:[%s3361_s1 + $0x40] ss:$16 sps:$4 sm:$0xff]  }
   0xc   :  { %1298 = vmatpush1.bf16.msra.mxu1 %v2247_v11  ;;  %1258 = vmatprep.subr.bf16.mxu0 %v2248_v12  ;;  %v2262_v21 = vld [vmem:[%s3361_s1 + $0x244] ss:$16 sps:$4 sm:$0xff]   ;;  %v2265_v23 = vld [vmem:[%s3361_s1 + $0x240] ss:$16 sps:$4 sm:$0xff]   ;;  %v2341_v11 = vld [vmem:[%s3361_s1 + $0xec] ss:$16 sps:$4 sm:$0xff]  }
   0xd   :  { %1299 = vmatprep.subr.bf16.mxu1 %v2250_v13  ;;  %v2266_v24 = vld [vmem:[%s3361_s1 + $0x24] ss:$16 sps:$4 sm:$0xff]   ;;  %v2270_v26 = vld [vmem:[%s3361_s1 + $0x20] ss:$16 sps:$4 sm:$0xff]   ;;  %v2585_v13 = vmov 0  }
   0xe   :  { %v2268_v25 = vld [vmem:[%s3361_s1 + $0x224] ss:$16 sps:$4 sm:$0xff]   ;;  %v2271_v27 = vld [vmem:[%s3361_s1 + $0x220] ss:$16 sps:$4 sm:$0xff]  }
   0xf   :  { %1259 = vmatpush1.bf16.msra.mxu0 %v2252_v14  ;;  %v2272_v28 = vld [vmem:[%s3361_s1 + $0x4] ss:$16 sps:$4 sm:$0xff]   ;;  %v2276_v30 = vld [vmem:[%s3361_s1] ss:$16 sps:$4 sm:$0xff]  }
  0x10   :  { %1300 = vmatpush1.bf16.msra.mxu1 %v2253_v15  ;;  %1260 = vmatprep.subr.bf16.mxu0 %v2254_v16  ;;  %v2274_v29 = vld [vmem:[%s3361_s1 + $0x204] ss:$16 sps:$4 sm:$0xff]   ;;  %v2277_v31 = vld [vmem:[%s3361_s1 + $0x200] ss:$16 sps:$4 sm:$0xff]   ;;  %v2339_v15 = vld [vmem:[%s3361_s1 + $0xe8] ss:$16 sps:$4 sm:$0xff]  }
  0x11   :  { %1301 = vmatprep.subr.bf16.mxu1 %v2256_v17  ;;  %v2278_v32 = vld [vmem:[%s3361_s1 + $0x1e4] ss:$16 sps:$4 sm:$0xff]   ;;  %v2282_v34 = vld [vmem:[%s3361_s1 + $0x1e0] ss:$16 sps:$4 sm:$0xff]   ;;  %v2861_v17 = vld [vmem:[%s3360_s0 + $0x18] ss:$0 sps:$4 sm:$0xff]  }
  0x12   :  { %v2280_v33 = vld [vmem:[%s3361_s1 + $0x3e4] ss:$16 sps:$4 sm:$0xff]   ;;  %v2283_v35 = vld [vmem:[%s3361_s1 + $0x3e0] ss:$16 sps:$4 sm:$0xff]  }
  0x13   :  { %1261 = vmatpush1.bf16.msra.mxu0 %v2258_v18  ;;  %v2284_v36 = vld [vmem:[%s3361_s1 + $0x1c4] ss:$16 sps:$4 sm:$0xff]   ;;  %v2288_v38 = vld [vmem:[%s3361_s1 + $0x1c0] ss:$16 sps:$4 sm:$0xff]   ;;  %v2348_v18 = vld [vmem:[%s3361_s1 + $0xcc] ss:$16 sps:$4 sm:$0xff]  }
  0x14   :  { %1302 = vmatpush1.bf16.msra.mxu1 %v2259_v19  ;;  %1262 = vmatprep.subr.bf16.mxu0 %v2260_v20  ;;  %v2286_v37 = vld [vmem:[%s3361_s1 + $0x3c4] ss:$16 sps:$4 sm:$0xff]   ;;  %v2289_v39 = vld [vmem:[%s3361_s1 + $0x3c0] ss:$16 sps:$4 sm:$0xff]   ;;  %v2346_v20 = vld [vmem:[%s3361_s1 + $0xc8] ss:$16 sps:$4 sm:$0xff]  }
  0x15   :  { %1303 = vmatprep.subr.bf16.mxu1 %v2262_v21  ;;  %v2290_v40 = vld [vmem:[%s3361_s1 + $0x1a4] ss:$16 sps:$4 sm:$0xff]   ;;  %v2294_v42 = vld [vmem:[%s3361_s1 + $0x1a0] ss:$16 sps:$4 sm:$0xff]  }
  0x16   :  { %v2292_v41 = vld [vmem:[%s3361_s1 + $0x3a4] ss:$16 sps:$4 sm:$0xff]   ;;  %v2295_v43 = vld [vmem:[%s3361_s1 + $0x3a0] ss:$16 sps:$4 sm:$0xff]  }
  0x17   :  { %1263 = vmatpush1.bf16.msra.mxu0 %v2264_v22  ;;  %v2296_v44 = vld [vmem:[%s3361_s1 + $0x184] ss:$16 sps:$4 sm:$0xff]   ;;  %v2300_v49 = vld [vmem:[%s3361_s1 + $0x180] ss:$16 sps:$4 sm:$0xff]   ;;  %v2354_v22 = vld [vmem:[%s3361_s1 + $0xac] ss:$16 sps:$4 sm:$0xff]  }
  0x18   :  { %1304 = vmatpush1.bf16.msra.mxu1 %v2265_v23  ;;  %1264 = vmatprep.subr.bf16.mxu0 %v2266_v24  ;;  %v2298_v45 = vld [vmem:[%s3361_s1 + $0x384] ss:$16 sps:$4 sm:$0xff]   ;;  %v2301_v50 = vld [vmem:[%s3361_s1 + $0x380] ss:$16 sps:$4 sm:$0xff]   ;;  %v2352_v24 = vld [vmem:[%s3361_s1 + $0xa8] ss:$16 sps:$4 sm:$0xff]  }
  0x19   :  { %1305 = vmatprep.subr.bf16.mxu1 %v2268_v25  ;;  %v22_v46 = vld [vmem:[%s3360_s0] sm:$0xff] }
  0x1a   :  { %v2758_v47 = vcombine.high %v22_v46, %v22_v46  ;;  %v2302_v52 = vld [vmem:[%s3361_s1 + $0x164] ss:$16 sps:$4 sm:$0xff]   ;;  %v2306_v54 = vld [vmem:[%s3361_s1 + $0x160] ss:$16 sps:$4 sm:$0xff]   ;;  %v2827_v6 = vcombine.low %v22_v46, %v22_v46  ;;  %v2382_v46 = vld [vmem:[%s3361_s1 + $0x8] ss:$16 sps:$4 sm:$0xff]  }
  0x1b   :  { %1265 = vmatpush1.bf16.msra.mxu0 %v2270_v26  ;;  %v2304_v53 = vld [vmem:[%s3361_s1 + $0x364] ss:$16 sps:$4 sm:$0xff]   ;;  %v2307_v55 = vld [vmem:[%s3361_s1 + $0x360] ss:$16 sps:$4 sm:$0xff]   ;;  %v2360_v26 = vld [vmem:[%s3361_s1 + $0x8c] ss:$16 sps:$4 sm:$0xff]  }
  0x1c   :  { %1306 = vmatpush1.bf16.msra.mxu1 %v2271_v27  ;;  %1266 = vmatprep.subr.bf16.mxu0 %v2272_v28  ;;  %v2308_v56 = vld [vmem:[%s3361_s1 + $0x144] ss:$16 sps:$4 sm:$0xff]   ;;  %v2312_v58 = vld [vmem:[%s3361_s1 + $0x140] ss:$16 sps:$4 sm:$0xff]   ;;  %v2358_v28 = vld [vmem:[%s3361_s1 + $0x88] ss:$16 sps:$4 sm:$0xff]  }
  0x1d   :  { %1307 = vmatprep.subr.bf16.mxu1 %v2274_v29  ;;  %1284 = vmatprep.mubr.bf16.mxu0 %v2758_v47  ;;  %v2310_v57 = vld [vmem:[%s3361_s1 + $0x344] ss:$16 sps:$4 sm:$0xff]   ;;  %v2313_v59 = vld [vmem:[%s3361_s1 + $0x340] ss:$16 sps:$4 sm:$0xff]  }
  0x1e   :  { %v2314_v60 = vld [vmem:[%s3361_s1 + $0x124] ss:$16 sps:$4 sm:$0xff]   ;;  %v2318_v62 = vld [vmem:[%s3361_s1 + $0x120] ss:$16 sps:$4 sm:$0xff]  }
  0x1f   :  { %1267 = vmatpush1.bf16.msra.mxu0 %v2276_v30  ;;  %v2316_v61 = vld [vmem:[%s3361_s1 + $0x324] ss:$16 sps:$4 sm:$0xff]   ;;  %v2319_v63 = vld [vmem:[%s3361_s1 + $0x320] ss:$16 sps:$4 sm:$0xff]   ;;  %v2366_v30 = vld [vmem:[%s3361_s1 + $0x6c] ss:$16 sps:$4 sm:$0xff]  }
  0x20   :  { %1308 = vmatpush1.bf16.msra.mxu1 %v2277_v31  ;;  %1268 = vmatprep.subr.bf16.mxu0 %v2278_v32  ;;  %v2320_v0 = vld [vmem:[%s3361_s1 + $0x104] ss:$16 sps:$4 sm:$0xff]   ;;  %v2324_v2 = vld [vmem:[%s3361_s1 + $0x100] ss:$16 sps:$4 sm:$0xff]  }
  0x21   :  { %1309 = vmatprep.subr.bf16.mxu1 %v2280_v33  ;;  %v2322_v1 = vld [vmem:[%s3361_s1 + $0x304] ss:$16 sps:$4 sm:$0xff]   ;;  %v2325_v3 = vld [vmem:[%s3361_s1 + $0x300] ss:$16 sps:$4 sm:$0xff]  }
  0x22   :  { %v2332_v4 = vld [vmem:[%s3361_s1 + $0x4e4] ss:$16 sps:$4 sm:$0xff]   ;;  %v2330_v8 = vld [vmem:[%s3361_s1 + $0x4e0] ss:$16 sps:$4 sm:$0xff]  }
  0x23   :  { %1269 = vmatpush2.bf16.msra.mxu0 %v2282_v34  ;;  %v2335_v5 = vld [vmem:[%s3361_s1 + $0x604] ss:$16 sps:$4 sm:$0xff]   ;;  %v2333_v9 = vld [vmem:[%s3361_s1 + $0x600] ss:$16 sps:$4 sm:$0xff]   ;;  %v2364_v34 = vld [vmem:[%s3361_s1 + $0x68] ss:$16 sps:$4 sm:$0xff]  }
  0x24   :  { %1310 = vmatpush2.bf16.msra.mxu1 %v2283_v35  ;;  %1270 = vmatprep.subr.bf16.mxu0 %v2284_v36  ;;  %v2338_v10 = vld [vmem:[%s3361_s1 + $0x4c4] ss:$16 sps:$4 sm:$0xff]   ;;  %v2336_v12 = vld [vmem:[%s3361_s1 + $0x4c0] ss:$16 sps:$4 sm:$0xff]   ;;  %v2372_v36 = vld [vmem:[%s3361_s1 + $0x4c] ss:$16 sps:$4 sm:$0xff]  }
  0x25   :  { %1311 = vmatprep.subr.bf16.mxu1 %v2286_v37  ;;  %v2344_v14 = vld [vmem:[%s3361_s1 + $0x4a4] ss:$16 sps:$4 sm:$0xff]   ;;  %v2342_v16 = vld [vmem:[%s3361_s1 + $0x4a0] ss:$16 sps:$4 sm:$0xff]  }
  0x26   :  { %v2351_v19 = vld [vmem:[%s3361_s1 + $0x484] ss:$16 sps:$4 sm:$0xff]   ;;  %v2349_v21 = vld [vmem:[%s3361_s1 + $0x480] ss:$16 sps:$4 sm:$0xff]  }
  0x27   :  { %1271 = vmatpush2.bf16.msra.mxu0 %v2288_v38  ;;  %v2357_v23 = vld [vmem:[%s3361_s1 + $0x464] ss:$16 sps:$4 sm:$0xff]   ;;  %v2355_v25 = vld [vmem:[%s3361_s1 + $0x460] ss:$16 sps:$4 sm:$0xff]   ;;  %v2370_v38 = vld [vmem:[%s3361_s1 + $0x48] ss:$16 sps:$4 sm:$0xff]  }
  0x28   :  { %1312 = vmatpush2.bf16.msra.mxu1 %v2289_v39  ;;  %1272 = vmatprep.subr.bf16.mxu0 %v2290_v40  ;;  %v2363_v27 = vld [vmem:[%s3361_s1 + $0x444] ss:$16 sps:$4 sm:$0xff]   ;;  %v2361_v29 = vld [vmem:[%s3361_s1 + $0x440] ss:$16 sps:$4 sm:$0xff]   ;;  %v2378_v40 = vld [vmem:[%s3361_s1 + $0x2c] ss:$16 sps:$4 sm:$0xff]  }
  0x29   :  { %1313 = vmatprep.subr.bf16.mxu1 %v2292_v41  ;;  %v2369_v31 = vld [vmem:[%s3361_s1 + $0x424] ss:$16 sps:$4 sm:$0xff]   ;;  %v2367_v35 = vld [vmem:[%s3361_s1 + $0x420] ss:$16 sps:$4 sm:$0xff]  }
  0x2a   :  { %v2911_v32 = vld [vmem:[%s3360_s0 + $0x10] sm:$0xff] }
  0x2b   :  { %1273 = vmatpush2.bf16.msra.mxu0 %v2294_v42  ;;  %v2915_v33 = vcombine.high %v2911_v32, %v2911_v32  ;;  %v2375_v37 = vld [vmem:[%s3361_s1 + $0x404] ss:$16 sps:$4 sm:$0xff]   ;;  %v2373_v39 = vld [vmem:[%s3361_s1 + $0x400] ss:$16 sps:$4 sm:$0xff]   ;;  %v2376_v42 = vld [vmem:[%s3361_s1 + $0x28] ss:$16 sps:$4 sm:$0xff]  }
  0x2c   :  { %1314 = vmatpush2.bf16.msra.mxu1 %v2295_v43  ;;  %1274 = vmatprep.subr.bf16.mxu0 %v2296_v44  ;;  %v2381_v41 = vld [vmem:[%s3361_s1 + $0x5e4] ss:$16 sps:$4 sm:$0xff]   ;;  %v2379_v43 = vld [vmem:[%s3361_s1 + $0x5e0] ss:$16 sps:$4 sm:$0xff]   ;;  %v2384_v44 = vld [vmem:[%s3361_s1 + $0xc] ss:$16 sps:$4 sm:$0xff]  }
  0x2d   :  { %1315 = vmatprep.subr.bf16.mxu1 %v2298_v45  ;;  %v2387_v45 = vld [vmem:[%s3361_s1 + $0x5c4] ss:$16 sps:$4 sm:$0xff]  }
  0x2f   :  { %1275 = vmatpush2.bf16.msra.mxu0 %v2300_v49  ;;  %v2393_v49 = vld [vmem:[%s3361_s1 + $0x5a4] ss:$16 sps:$4 sm:$0xff]  }
  0x30   :  { %1316 = vmatpush2.bf16.msra.mxu1 %v2301_v50  ;;  %1276 = vmatprep.subr.bf16.mxu0 %v2302_v52  ;;  %v2388_v50 = vld [vmem:[%s3361_s1 + $0x1e8] ss:$16 sps:$4 sm:$0xff]   ;;  %v2391_v52 = vld [vmem:[%s3361_s1 + $0x5a0] ss:$16 sps:$4 sm:$0xff]  }
  0x31   :  { %1317 = vmatprep.subr.bf16.mxu1 %v2304_v53  ;;  %v2396_v53 = vld [vmem:[%s3361_s1 + $0x1cc] ss:$16 sps:$4 sm:$0xff]  }
  0x33   :  { %1277 = vmatpush2.bf16.msra.mxu0 %v2306_v54  ;;  %v2399_v54 = vld [vmem:[%s3361_s1 + $0x584] ss:$16 sps:$4 sm:$0xff]  }
  0x34   :  { %1318 = vmatpush2.bf16.msra.mxu1 %v2307_v55  ;;  %1278 = vmatprep.subr.bf16.mxu0 %v2308_v56  ;;  %v2394_v55 = vld [vmem:[%s3361_s1 + $0x1c8] ss:$16 sps:$4 sm:$0xff]   ;;  %v2397_v56 = vld [vmem:[%s3361_s1 + $0x580] ss:$16 sps:$4 sm:$0xff]  }
  0x35   :  { %1319 = vmatprep.subr.bf16.mxu1 %v2310_v57  ;;  %v2402_v57 = vld [vmem:[%s3361_s1 + $0x1ac] ss:$16 sps:$4 sm:$0xff]  }
  0x37   :  { %1279 = vmatpush2.bf16.msra.mxu0 %v2312_v58  ;;  %v2405_v58 = vld [vmem:[%s3361_s1 + $0x564] ss:$16 sps:$4 sm:$0xff]  }
  0x38   :  { %1320 = vmatpush2.bf16.msra.mxu1 %v2313_v59  ;;  %1280 = vmatprep.subr.bf16.mxu0 %v2314_v60  ;;  %v2400_v59 = vld [vmem:[%s3361_s1 + $0x1a8] ss:$16 sps:$4 sm:$0xff]   ;;  %v2403_v60 = vld [vmem:[%s3361_s1 + $0x560] ss:$16 sps:$4 sm:$0xff]  }
  0x39   :  { %1321 = vmatprep.subr.bf16.mxu1 %v2316_v61  ;;  %v2408_v61 = vld [vmem:[%s3361_s1 + $0x18c] ss:$16 sps:$4 sm:$0xff]  }
  0x3b   :  { %1281 = vmatpush2.bf16.msra.mxu0 %v2318_v62  ;;  %v2411_v62 = vld [vmem:[%s3361_s1 + $0x544] ss:$16 sps:$4 sm:$0xff]  }
  0x3c   :  { %1322 = vmatpush2.bf16.msra.mxu1 %v2319_v63  ;;  %1282 = vmatprep.subr.bf16.mxu0 %v2320_v0  ;;  %v2406_v63 = vld [vmem:[%s3361_s1 + $0x188] ss:$16 sps:$4 sm:$0xff]   ;;  %v2409_v0 = vld [vmem:[%s3361_s1 + $0x540] ss:$16 sps:$4 sm:$0xff]  }
  0x3d   :  { %1323 = vmatprep.subr.bf16.mxu1 %v2322_v1  ;;  %v2414_v1 = vld [vmem:[%s3361_s1 + $0x16c] ss:$16 sps:$4 sm:$0xff]  }
  0x3f   :  { %1283 = vmatpush2.bf16.msra.mxu0 %v2324_v2  ;;  %v2417_v2 = vld [vmem:[%s3361_s1 + $0x524] ss:$16 sps:$4 sm:$0xff]  }
  0x40   :  { %1324 = vmatpush2.bf16.msra.mxu1 %v2325_v3  ;;  %1334 = vmatprep.subr.bf16.mxu0 %v2332_v4  ;;  %v2412_v3 = vld [vmem:[%s3361_s1 + $0x168] ss:$16 sps:$4 sm:$0xff]   ;;  %v2415_v4 = vld [vmem:[%s3361_s1 + $0x520] ss:$16 sps:$4 sm:$0xff]  }
  0x41   :  { %1389 = vmatprep.subr.bf16.mxu1 %v2335_v5  ;;  %v2420_v5 = vld [vmem:[%s3361_s1 + $0x14c] ss:$16 sps:$4 sm:$0xff]  }
  0x42   :  { %1285 = vmatmul.mubr.bf16.vlgmr.msra.gmra.mxu0 %v2827_v6 }
  0x43   :  { %1326 = vmatmul.mubr.bf16.vlgmr.msra.gmra.mxu1 %v2829_v7  ;;  %1335 = vmatpush1.bf16.msra.mxu0 %v2330_v8  ;;  %v2423_v8 = vld [vmem:[%s3361_s1 + $0x504] ss:$16 sps:$4 sm:$0xff]  }
  0x44   :  { %1390 = vmatpush1.bf16.msra.mxu1 %v2333_v9  ;;  %1336 = vmatprep.subr.bf16.mxu0 %v2338_v10  ;;  %v2418_v9 = vld [vmem:[%s3361_s1 + $0x148] ss:$16 sps:$4 sm:$0xff]   ;;  %v2421_v10 = vld [vmem:[%s3361_s1 + $0x500] ss:$16 sps:$4 sm:$0xff]  }
  0x45   :  { %1407 = vmatprep.mubr.bf16.mxu1 %v2585_v13  ;;  %1416 = vmatprep.subr.bf16.mxu1 %v2341_v11  ;;  %v2428_v11 = vld [vmem:[%s3361_s1 + $0x12c] ss:$16 sps:$4 sm:$0xff]  }
  0x46   :  { %1366 = vmatprep.mubr.bf16.mxu0 %v2915_v33 }
  0x47   :  { %1337 = vmatpush1.bf16.msra.mxu0 %v2336_v12  ;;  %v2431_v12 = vld [vmem:[%s3361_s1 + $0x2ec] ss:$16 sps:$4 sm:$0xff]  }
  0x48   :  { %1338 = vmatprep.subr.bf16.mxu0 %v2344_v14  ;;  %v3040_v14 = vcombine.low %v2911_v32, %v2911_v32  ;;  %v2458_v32 = vld [vmem:[%s3361_s1 + $0x48c] ss:$16 sps:$4 sm:$0xff]  }
  0x4b   :  { %2149 = vmatmul.mubr.msk.bf16.vlgmr.msra.gmra.mxu1 %vm1248_vm0, %v2861_v17  ;;  %1339 = vmatpush1.bf16.msra.mxu0 %v2342_v16  ;;  %v2429_v16 = vld [vmem:[%s3361_s1 + $0x2e8] ss:$16 sps:$4 sm:$0xff]  }
  0x4c   :  { %1417 = vmatpush1.bf16.msra.mxu1 %v2339_v15  ;;  %1340 = vmatprep.subr.bf16.mxu0 %v2351_v19  ;;  %v2426_v15 = vld [vmem:[%s3361_s1 + $0x128] ss:$16 sps:$4 sm:$0xff]   ;;  %v2437_v19 = vld [vmem:[%s3361_s1 + $0x2cc] ss:$16 sps:$4 sm:$0xff]  }
  0x4d   :  { %1418 = vmatprep.subr.bf16.mxu1 %v2348_v18  ;;  %1448 = vmatprep.mubr.bf16.mxu1 %v2758_v47  ;;  %v2385_v47 = vld [vmem:[%s3361_s1 + $0x5c0] ss:$16 sps:$4 sm:$0xff]   ;;  %v2434_v18 = vld [vmem:[%s3361_s1 + $0x10c] ss:$16 sps:$4 sm:$0xff]  }
  0x4f   :  { %1341 = vmatpush1.bf16.msra.mxu0 %v2349_v21  ;;  %v2435_v21 = vld [vmem:[%s3361_s1 + $0x2c8] ss:$16 sps:$4 sm:$0xff]  }
  0x50   :  { %1419 = vmatpush1.bf16.msra.mxu1 %v2346_v20  ;;  %1342 = vmatprep.subr.bf16.mxu0 %v2357_v23  ;;  %v2432_v20 = vld [vmem:[%s3361_s1 + $0x108] ss:$16 sps:$4 sm:$0xff]   ;;  %v2443_v23 = vld [vmem:[%s3361_s1 + $0x2ac] ss:$16 sps:$4 sm:$0xff]  }
  0x51   :  { %1420 = vmatprep.subr.bf16.mxu1 %v2354_v22  ;;  %v2440_v22 = vld [vmem:[%s3361_s1 + $0x4ec] ss:$16 sps:$4 sm:$0xff]  }
  0x53   :  { %1343 = vmatpush1.bf16.msra.mxu0 %v2355_v25  ;;  %v2441_v25 = vld [vmem:[%s3361_s1 + $0x2a8] ss:$16 sps:$4 sm:$0xff]  }
  0x54   :  { %1421 = vmatpush1.bf16.msra.mxu1 %v2352_v24  ;;  %1344 = vmatprep.subr.bf16.mxu0 %v2363_v27  ;;  %v2438_v24 = vld [vmem:[%s3361_s1 + $0x4e8] ss:$16 sps:$4 sm:$0xff]   ;;  %v2449_v27 = vld [vmem:[%s3361_s1 + $0x28c] ss:$16 sps:$4 sm:$0xff]  }
  0x55   :  { %1422 = vmatprep.subr.bf16.mxu1 %v2360_v26  ;;  %v2446_v26 = vld [vmem:[%s3361_s1 + $0x4cc] ss:$16 sps:$4 sm:$0xff]  }
  0x57   :  { %1345 = vmatpush1.bf16.msra.mxu0 %v2361_v29  ;;  %v2452_v29 = vld [vmem:[%s3361_s1 + $0x4ac] ss:$16 sps:$4 sm:$0xff]  }
  0x58   :  { %1423 = vmatpush1.bf16.msra.mxu1 %v2358_v28  ;;  %1346 = vmatprep.subr.bf16.mxu0 %v2369_v31  ;;  %v2444_v28 = vld [vmem:[%s3361_s1 + $0x4c8] ss:$16 sps:$4 sm:$0xff]  }
  0x59   :  { %1424 = vmatprep.subr.bf16.mxu1 %v2366_v30  ;;  %v2455_v30 = vld [vmem:[%s3361_s1 + $0x26c] ss:$16 sps:$4 sm:$0xff]   ;;  %v2450_v31 = vld [vmem:[%s3361_s1 + $0x4a8] ss:$16 sps:$4 sm:$0xff]  }
  0x5b   :  { %1347 = vmatpush1.bf16.msra.mxu0 %v2367_v35  ;;  %v2456_v35 = vld [vmem:[%s3361_s1 + $0x488] ss:$16 sps:$4 sm:$0xff]  }
  0x5c   :  { %1425 = vmatpush1.bf16.msra.mxu1 %v2364_v34  ;;  %1348 = vmatprep.subr.bf16.mxu0 %v2375_v37  ;;  %v2461_v34 = vld [vmem:[%s3361_s1 + $0x24c] ss:$16 sps:$4 sm:$0xff]  }
  0x5d   :  { %1426 = vmatprep.subr.bf16.mxu1 %v2372_v36  ;;  %v2464_v36 = vld [vmem:[%s3361_s1 + $0x46c] ss:$16 sps:$4 sm:$0xff]  }
  0x5e   :  { %v2467_v37 = vld [vmem:[%s3361_s1 + $0x22c] ss:$16 sps:$4 sm:$0xff]  }
  0x5f   :  { %1349 = vmatpush1.bf16.msra.mxu0 %v2373_v39  ;;  %v2465_v39 = vld [vmem:[%s3361_s1 + $0x228] ss:$16 sps:$4 sm:$0xff]  }
  0x60   :  { %1427 = vmatpush1.bf16.msra.mxu1 %v2370_v38  ;;  %1350 = vmatprep.subr.bf16.mxu0 %v2381_v41  ;;  %v2462_v38 = vld [vmem:[%s3361_s1 + $0x468] ss:$16 sps:$4 sm:$0xff]   ;;  %v2473_v41 = vld [vmem:[%s3361_s1 + $0x20c] ss:$16 sps:$4 sm:$0xff]  }
  0x61   :  { %1428 = vmatprep.subr.bf16.mxu1 %v2378_v40  ;;  %v2470_v40 = vld [vmem:[%s3361_s1 + $0x44c] ss:$16 sps:$4 sm:$0xff]  }
  0x63   :  { %1351 = vmatpush2.bf16.msra.mxu0 %v2379_v43  ;;  %v2471_v43 = vld [vmem:[%s3361_s1 + $0x208] ss:$16 sps:$4 sm:$0xff]  }
  0x64   :  { %1429 = vmatpush1.bf16.msra.mxu1 %v2376_v42  ;;  %1352 = vmatprep.subr.bf16.mxu0 %v2387_v45  ;;  %v2468_v42 = vld [vmem:[%s3361_s1 + $0x448] ss:$16 sps:$4 sm:$0xff]   ;;  %v2479_v45 = vld [vmem:[%s3361_s1 + $0x3ec] ss:$16 sps:$4 sm:$0xff]  }
  0x65   :  { %1430 = vmatprep.subr.bf16.mxu1 %v2384_v44  ;;  %v2476_v44 = vld [vmem:[%s3361_s1 + $0x42c] ss:$16 sps:$4 sm:$0xff]  }
  0x67   :  { %1353 = vmatpush2.bf16.msra.mxu0 %v2385_v47 }
  0x68   :  { %1431 = vmatpush1.bf16.msra.mxu1 %v2382_v46  ;;  %1354 = vmatprep.subr.bf16.mxu0 %v2393_v49 }
  0x69   :  { %1432 = vmatprep.subr.bf16.mxu1 %v2390_v48 }
  0x6b   :  { %1355 = vmatpush2.bf16.msra.mxu0 %v2391_v52 }
  0x6c   :  { %1433 = vmatpush2.bf16.msra.mxu1 %v2388_v50  ;;  %1356 = vmatprep.subr.bf16.mxu0 %v2399_v54 }
  0x6d   :  { %1434 = vmatprep.subr.bf16.mxu1 %v2396_v53 }
  0x6f   :  { %1357 = vmatpush2.bf16.msra.mxu0 %v2397_v56 }
  0x70   :  { %1435 = vmatpush2.bf16.msra.mxu1 %v2394_v55  ;;  %1358 = vmatprep.subr.bf16.mxu0 %v2405_v58 }
  0x71   :  { %1436 = vmatprep.subr.bf16.mxu1 %v2402_v57 }
  0x73   :  { %1359 = vmatpush2.bf16.msra.mxu0 %v2403_v60 }
  0x74   :  { %1437 = vmatpush2.bf16.msra.mxu1 %v2400_v59  ;;  %1360 = vmatprep.subr.bf16.mxu0 %v2411_v62 }
  0x75   :  { %1438 = vmatprep.subr.bf16.mxu1 %v2408_v61 }
  0x77   :  { %1361 = vmatpush2.bf16.msra.mxu0 %v2409_v0 }
  0x78   :  { %1439 = vmatpush2.bf16.msra.mxu1 %v2406_v63  ;;  %1362 = vmatprep.subr.bf16.mxu0 %v2417_v2 }
  0x79   :  { %1440 = vmatprep.subr.bf16.mxu1 %v2414_v1 }
  0x7b   :  { %1363 = vmatpush2.bf16.msra.mxu0 %v2415_v4 }
  0x7c   :  { %1441 = vmatpush2.bf16.msra.mxu1 %v2412_v3  ;;  %1364 = vmatprep.subr.bf16.mxu0 %v2423_v8 }
  0x7d   :  { %1442 = vmatprep.subr.bf16.mxu1 %v2420_v5 }
  0x7f   :  { %1365 = vmatpush2.bf16.msra.mxu0 %v2421_v10 }
  0x80   :  { %1443 = vmatpush2.bf16.msra.mxu1 %v2418_v9  ;;  %1457 = vmatprep.subr.bf16.mxu0 %v2431_v12 }
  0x81   :  { %1444 = vmatprep.subr.bf16.mxu1 %v2428_v11 }
  0x82   :  { %1367 = vmatmul.mubr.bf16.vlgmr.msra.gmra.mxu0 %v3040_v14 }
  0x83   :  { %1458 = vmatpush1.bf16.msra.mxu0 %v2429_v16  ;;  %1489 = vmatprep.mubr.bf16.mxu0 %v2769_v51  ;;  %v2447_v51 = vld [vmem:[%s3361_s1 + $0x288] ss:$16 sps:$4 sm:$0xff]  }
  0x84   :  { %1445 = vmatpush2.bf16.msra.mxu1 %v2426_v15  ;;  %1459 = vmatprep.subr.bf16.mxu0 %v2437_v19 }
  0x85   :  { %1446 = vmatprep.subr.bf16.mxu1 %v2434_v18 }
  0x87   :  { %1460 = vmatpush1.bf16.msra.mxu0 %v2435_v21 }
  0x88   :  { %1447 = vmatpush2.bf16.msra.mxu1 %v2432_v20  ;;  %1461 = vmatprep.subr.bf16.mxu0 %v2443_v23 }
  0x89   :  { %1498 = vmatprep.subr.bf16.mxu1 %v2440_v22 }
  0x8b   :  { %1449 = vmatmul.mubr.bf16.vlgmr.msra.gmra.mxu1 %v2827_v6  ;;  %1462 = vmatpush1.bf16.msra.mxu0 %v2441_v25  ;;  %v2453_v6 = vld [vmem:[%s3361_s1 + $0x268] ss:$16 sps:$4 sm:$0xff]  }
  0x8c   :  { %1499 = vmatpush1.bf16.msra.mxu1 %v2438_v24  ;;  %1463 = vmatprep.subr.bf16.mxu0 %v2449_v27 }
  0x8d   :  { %1500 = vmatprep.subr.bf16.mxu1 %v2446_v26  ;;  %1530 = vmatprep.mubr.bf16.mxu1 %v2915_v33  ;;  %v2459_v33 = vld [vmem:[%s3361_s1 + $0x248] ss:$16 sps:$4 sm:$0xff]  }
  0x8f   :  { %1464 = vmatpush1.bf16.msra.mxu0 %v2447_v51 }
  0x90   :  { %1501 = vmatpush1.bf16.msra.mxu1 %v2444_v28  ;;  %1465 = vmatprep.subr.bf16.mxu0 %v2455_v30 }
  0x91   :  { %1502 = vmatprep.subr.bf16.mxu1 %v2452_v29 }
  0x93   :  { %1466 = vmatpush1.bf16.msra.mxu0 %v2453_v6 }
  0x94   :  { %1503 = vmatpush1.bf16.msra.mxu1 %v2450_v31  ;;  %1467 = vmatprep.subr.bf16.mxu0 %v2461_v34 }
  0x95   :  { %1504 = vmatprep.subr.bf16.mxu1 %v2458_v32 }
  0x97   :  { %1468 = vmatpush1.bf16.msra.mxu0 %v2459_v33 }
  0x98   :  { %1505 = vmatpush1.bf16.msra.mxu1 %v2456_v35  ;;  %1469 = vmatprep.subr.bf16.mxu0 %v2467_v37 }
  0x99   :  { %1506 = vmatprep.subr.bf16.mxu1 %v2464_v36 }
  0x9b   :  { %1470 = vmatpush1.bf16.msra.mxu0 %v2465_v39 }
  0x9c   :  { %1507 = vmatpush1.bf16.msra.mxu1 %v2462_v38  ;;  %1471 = vmatprep.subr.bf16.mxu0 %v2473_v41 }
  0x9d   :  { %1508 = vmatprep.subr.bf16.mxu1 %v2470_v40 }
  0x9e   :  { %10 = vsyncpa [#allocation3], 0  ;;  %v2474_v46 = vld [vmem:[%s3361_s1 + $0x428] ss:$16 sps:$4 sm:$0xff]   ;;  %v2482_v48 = vld [vmem:[%s3361_s1 + $0x40c] ss:$16 sps:$4 sm:$0xff]  }
  0x9f   :  { %1472 = vmatpush1.bf16.msra.mxu0 %v2471_v43  ;;  %v2477_v47 = vld [vmem:[%s3361_s1 + $0x3e8] ss:$16 sps:$4 sm:$0xff]   ;;  %v2485_v49 = vld [vmem:[%s3361_s1 + $0x3cc] ss:$16 sps:$4 sm:$0xff]   ;;  %v2533_v26 = vld [vmem:[%s3363_s3 + $0x70] sm:$0xff]   ;;  %s2586_s20 = smov [#allocation2]  }
  0xa0   :  { %1509 = vmatpush1.bf16.msra.mxu1 %v2468_v42  ;;  %1473 = vmatprep.subr.bf16.mxu0 %v2479_v45  ;;  %v2480_v50 = vld [vmem:[%s3361_s1 + $0x408] ss:$16 sps:$4 sm:$0xff]   ;;  %v2488_v53 = vld [vmem:[%s3361_s1 + $0x5ec] ss:$16 sps:$4 sm:$0xff]   ;;  %v2549_v51 = vld [vmem:[%s3363_s3 + $0xf0] sm:$0xff]   ;;  %s1938_s21 = sshll.u32 %s2586_s20, 4  ;;  %s1939_s21 = int_to_ptr.vmem [resolvable:$true] %s1938_s21 }
  0xa1   :  { %1510 = vmatprep.subr.bf16.mxu1 %v2476_v44  ;;  %v2483_v52 = vld [vmem:[%s3361_s1 + $0x3c8] ss:$16 sps:$4 sm:$0xff]   ;;  %v2491_v54 = vld [vmem:[%s3361_s1 + $0x3ac] ss:$16 sps:$4 sm:$0xff]   ;;  %v2538_v29 = vld [vmem:[%s3363_s3 + $0x20] sm:$0xff]   ;;  %s2563_s22 = scalar_lea.vmem %s1939_s21, 128  ;;  %p2568_p1 = scmp.lt.s32.totalorder %s1939_s21, %s1939_s21 }
  0xa2   :  { %v2486_v55 = vld [vmem:[%s3361_s1 + $0x5e8] ss:$16 sps:$4 sm:$0xff]   ;;  %v2494_v57 = vld [vmem:[%s3361_s1 + $0x5cc] ss:$16 sps:$4 sm:$0xff]   ;;  %v2550_v30 = vld [vmem:[%s3363_s3 + $0xb0] sm:$0xff]   ;;  %p2564_p0 = scmp.ne.s32.totalorder %s1939_s21, %s2563_s22  ;;  %p2569_p2 = scmp.lt.s32.totalorder %s2563_s22, %s2563_s22 }
  0xa3   :  { %1474 = vmatpush2.bf16.msra.mxu0 %v2477_v47  ;;  %v2489_v56 = vld [vmem:[%s3361_s1 + $0x3a8] ss:$16 sps:$4 sm:$0xff]   ;;  %v2497_v58 = vld [vmem:[%s3361_s1 + $0x38c] ss:$16 sps:$4 sm:$0xff]   ;;  %v2541_v35 = vld [vmem:[%s3363_s3 + $0x50] sm:$0xff]  }
  0xa4   :  { %1511 = vmatpush1.bf16.msra.mxu1 %v2474_v46  ;;  %1475 = vmatprep.subr.bf16.mxu0 %v2485_v49  ;;  %v2492_v59 = vld [vmem:[%s3361_s1 + $0x5c8] ss:$16 sps:$4 sm:$0xff]   ;;  %v2500_v61 = vld [vmem:[%s3361_s1 + $0x5ac] ss:$16 sps:$4 sm:$0xff]   ;;  %v2553_v33 = vld [vmem:[%s3363_s3 + $0xe0] sm:$0xff]   ;;  %p2570_p3 = por %p2569_p2, %p2568_p1 }
  0xa5   :  { %1512 = vmatprep.subr.bf16.mxu1 %v2482_v48  ;;  %v2495_v60 = vld [vmem:[%s3361_s1 + $0x388] ss:$16 sps:$4 sm:$0xff]   ;;  %v2503_v62 = vld [vmem:[%s3361_s1 + $0x36c] ss:$16 sps:$4 sm:$0xff]   ;;  %v2542_v36 = vld [vmem:[%s3363_s3 + $0x10] sm:$0xff]  }
  0xa6   :  { %v2498_v63 = vld [vmem:[%s3361_s1 + $0x5a8] ss:$16 sps:$4 sm:$0xff]   ;;  %v2506_v1 = vld [vmem:[%s3361_s1 + $0x58c] ss:$16 sps:$4 sm:$0xff]   ;;  %v2545_v39 = vld [vmem:[%s3363_s3 + $0x40] sm:$0xff]   ;;  %p2571_p4 = pnand %p2570_p3, %p2564_p0 }
  0xa7   :  { %1476 = vmatpush2.bf16.msra.mxu0 %v2483_v52  ;;  %v2501_v0 = vld [vmem:[%s3361_s1 + $0x368] ss:$16 sps:$4 sm:$0xff]   ;;  %v2509_v2 = vld [vmem:[%s3361_s1 + $0x34c] ss:$16 sps:$4 sm:$0xff]   ;;  %v2546_v40 = vld [vmem:[%s3363_s3] sm:$0xff]  }
  0xa8   :  { %1513 = vmatpush1.bf16.msra.mxu1 %v2480_v50  ;;  %1477 = vmatprep.subr.bf16.mxu0 %v2491_v54  ;;  %v2504_v3 = vld [vmem:[%s3361_s1 + $0x588] ss:$16 sps:$4 sm:$0xff]   ;;  %v2512_v5 = vld [vmem:[%s3361_s1 + $0x56c] ss:$16 sps:$4 sm:$0xff]   ;;  %v2554_v41 = vld [vmem:[%s3363_s3 + $0xa0] sm:$0xff]  }
  0xa9   :  { %1514 = vmatprep.subr.bf16.mxu1 %v2488_v53  ;;  %v2507_v4 = vld [vmem:[%s3361_s1 + $0x348] ss:$16 sps:$4 sm:$0xff]   ;;  %v2515_v8 = vld [vmem:[%s3361_s1 + $0x32c] ss:$16 sps:$4 sm:$0xff]   ;;  %v2557_v53 = vld [vmem:[%s3363_s3 + $0xd0] sm:$0xff]  }
  0xaa   :  { %v2510_v9 = vld [vmem:[%s3361_s1 + $0x568] ss:$16 sps:$4 sm:$0xff]   ;;  %v2518_v11 = vld [vmem:[%s3361_s1 + $0x54c] ss:$16 sps:$4 sm:$0xff]   ;;  %v2558_v54 = vld [vmem:[%s3363_s3 + $0x90] sm:$0xff]  }
  0xab   :  { %1478 = vmatpush2.bf16.msra.mxu0 %v2489_v56  ;;  %v2513_v10 = vld [vmem:[%s3361_s1 + $0x328] ss:$16 sps:$4 sm:$0xff]   ;;  %v2521_v12 = vld [vmem:[%s3361_s1 + $0x30c] ss:$16 sps:$4 sm:$0xff]  }
  0xac   :  { %1515 = vmatpush2.bf16.msra.mxu1 %v2486_v55  ;;  %1479 = vmatprep.subr.bf16.mxu0 %v2497_v58  ;;  %v2516_v15 = vld [vmem:[%s3361_s1 + $0x548] ss:$16 sps:$4 sm:$0xff]   ;;  %v2524_v18 = vld [vmem:[%s3361_s1 + $0x52c] ss:$16 sps:$4 sm:$0xff]  }
  0xad   :  { %1516 = vmatprep.subr.bf16.mxu1 %v2494_v57  ;;  %v2519_v16 = vld [vmem:[%s3361_s1 + $0x308] ss:$16 sps:$4 sm:$0xff]   ;;  %v2527_v19 = vld [vmem:[%s3361_s1 + $0x60c] ss:$16 sps:$4 sm:$0xff]  }
  0xae   :  { %v2522_v20 = vld [vmem:[%s3361_s1 + $0x528] ss:$16 sps:$4 sm:$0xff]   ;;  %v2530_v22 = vld [vmem:[%s3361_s1 + $0x50c] ss:$16 sps:$4 sm:$0xff]  }
  0xaf   :  { %1480 = vmatpush2.bf16.msra.mxu0 %v2495_v60  ;;  %v2525_v21 = vld [vmem:[%s3361_s1 + $0x608] ss:$16 sps:$4 sm:$0xff]  }
  0xb0   :  { %1517 = vmatpush2.bf16.msra.mxu1 %v2492_v59  ;;  %1481 = vmatprep.subr.bf16.mxu0 %v2503_v62  ;;  %v2531_v23 = vld [vmem:[%s3363_s3 + $0x78] sm:$0xff]   ;;  %v2536_v27 = vld [vmem:[%s3363_s3 + $0x28] sm:$0xff]   ;;  %v2562_v62 = vld [vmem:[%s3363_s3 + $0x80] sm:$0xff]  }
  0xb1   :  { %1518 = vmatprep.subr.bf16.mxu1 %v2500_v61  ;;  %v2528_v24 = vld [vmem:[%s3361_s1 + $0x508] ss:$16 sps:$4 sm:$0xff]   ;;  %v2561_v61 = vld [vmem:[%s3363_s3 + $0xc0] sm:$0xff]  }
  0xb2   :  { %v2532_v25 = vld [vmem:[%s3363_s3 + $0x38] sm:$0xff]   ;;  %v2551_v6 = vld [vmem:[%s3363_s3 + $0xe8] sm:$0xff]  }
  0xb3   :  { %1482 = vmatpush2.bf16.msra.mxu0 %v2501_v0  ;;  %v2548_v28 = vld [vmem:[%s3363_s3 + $0xb8] sm:$0xff]   ;;  %v2552_v34 = vld [vmem:[%s3363_s3 + $0xa8] sm:$0xff]  }
  0xb4   :  { %1519 = vmatpush2.bf16.msra.mxu1 %v2498_v63  ;;  %1483 = vmatprep.subr.bf16.mxu0 %v2509_v2  ;;  %v2539_v31 = vld [vmem:[%s3363_s3 + $0x58] sm:$0xff]   ;;  %v2543_v37 = vld [vmem:[%s3363_s3 + $0x48] sm:$0xff]   ;;  %v224_v63 = vlaneseq  ;;  %v222_v2 = vld [vmem:[%s3362_s2] sm:$0xf] }
  0xb5   :  { %1520 = vmatprep.subr.bf16.mxu1 %v2506_v1  ;;  %v2540_v32 = vld [vmem:[%s3363_s3 + $0x18] sm:$0xff]   ;;  %v2544_v38 = vld [vmem:[%s3363_s3 + $0x8] sm:$0xff]  }
  0xb6   :  { %v2555_v46 = vld [vmem:[%s3363_s3 + $0xd8] sm:$0xff]   ;;  %v2559_v57 = vld [vmem:[%s3363_s3 + $0xc8] sm:$0xff]   ;;  %v225_v0 = vshrl.u32 %v224_v63, 7 }
  0xb7   :  { %1484 = vmatpush2.bf16.msra.mxu0 %v2507_v4  ;;  %v2556_v47 = vld [vmem:[%s3363_s3 + $0x98] sm:$0xff]   ;;  %v2560_v58 = vld [vmem:[%s3363_s3 + $0x88] sm:$0xff]  }
  0xb8   :  { %1521 = vmatpush2.bf16.msra.mxu1 %v2504_v3  ;;  %1485 = vmatprep.subr.bf16.mxu0 %v2515_v8  ;;  %v226_v1 = vsub.s32 0, %v225_v0  ;;  %v230_v3 = vsub.s32 1, %v225_v0 }
  0xb9   :  { %1522 = vmatprep.subr.bf16.mxu1 %v2512_v5 }
  0xba   :  { %v227_v4 = vrot.slane %v222_v2, %v226_v1  ;;  %v231_v5 = vrot.slane %v222_v2, %v230_v3 }
  0xbb   :  { %1486 = vmatpush2.bf16.msra.mxu0 %v2513_v10 }
  0xbc   :  { %1523 = vmatpush2.bf16.msra.mxu1 %v2510_v9  ;;  %1487 = vmatprep.subr.bf16.mxu0 %v2521_v12 }
  0xbd   :  { %1524 = vmatprep.subr.bf16.mxu1 %v2518_v11 }
  0xbf   :  { %1488 = vmatpush2.bf16.msra.mxu0 %v2519_v16 }
  0xc0   :  { %1525 = vmatpush2.bf16.msra.mxu1 %v2516_v15  ;;  %1553 = vmatprep.subr.bf16.mxu0 %v2527_v19 }
  0xc1   :  { %1526 = vmatprep.subr.bf16.mxu1 %v2524_v18 }
  0xc2   :  { %1490 = vmatmul.mubr.bf16.vlgmr.msra.gmra.mxu0 %v2829_v7  ;;  %v2534_v7 = vld [vmem:[%s3363_s3 + $0x30] sm:$0xff]  }
  0xc3   :  { %1554 = vmatpush1.bf16.msra.mxu0 %v2525_v21  ;;  %1571 = vmatprep.mubr.bf16.mxu0 %v2585_v13  ;;  %v2535_v13 = vld [vmem:[%s3363_s3 + $0x68] sm:$0xff]  }
  0xc4   :  { %1527 = vmatpush2.bf16.msra.mxu1 %v2522_v20  ;;  %2184 = vmatprep.subr.bf16.mxu0 %v2531_v23 }
  0xc5   :  { %1528 = vmatprep.subr.bf16.mxu1 %v2530_v22 }
  0xc8   :  { %1529 = vmatpush2.bf16.msra.mxu1 %v2528_v24 }
  0xca   :  { %2150 = vmatmul.mubr.msk.bf16.vlgmr.msra.gmra.mxu0 %vm1248_vm0, %v2861_v17  ;;  %v2547_v17 = vld [vmem:[%s3363_s3 + $0xf8] sm:$0xff]  }
  0xcb   :  { %1531 = vmatmul.mubr.bf16.vlgmr.msra.gmra.mxu1 %v3040_v14  ;;  %2185 = vmatpush3.bf16.msra.mxu0 %v2532_v25  ;;  %v2537_v14 = vld [vmem:[%s3363_s3 + $0x60] sm:$0xff]  }
  0xcc   :  { %2186 = vmatprep.subr.bf16.mxu0 %v2533_v26  ;;  %2206 = vmatprep.subr.bf16.mxu1 %v2547_v17  ;;  %v234_v17 = vsub.s32 2, %v225_v0 }
  0xcd   :  { %2207 = vmatpush3.bf16.msra.mxu1 %v2548_v28  ;;  %v238_v28 = vsub.s32 3, %v225_v0 }
  0xce   :  { %2208 = vmatprep.subr.bf16.mxu1 %v2549_v51 }
  0xcf   :  { %2187 = vmatpush3.bf16.msra.mxu0 %v2534_v7 }
  0xd0   :  { %2188 = vmatprep.subr.bf16.mxu0 %v2535_v13 }
  0xd1   :  { %2209 = vmatpush3.bf16.msra.mxu1 %v2550_v30 }
  0xd2   :  { %2210 = vmatprep.subr.bf16.mxu1 %v2551_v6 }
  0xd3   :  { %2189 = vmatpush3.bf16.msra.mxu0 %v2536_v27 }
  0xd4   :  { %2190 = vmatprep.subr.bf16.mxu0 %v2537_v14 }
  0xd5   :  { %2211 = vmatpush3.bf16.msra.mxu1 %v2552_v34 }
  0xd6   :  { %2212 = vmatprep.subr.bf16.mxu1 %v2553_v33 }
  0xd7   :  { %2191 = vmatpush3.bf16.msra.mxu0 %v2538_v29  ;;  %v235_v29 = vrot.slane %v222_v2, %v234_v17 }
  0xd8   :  { %2192 = vmatprep.subr.bf16.mxu0 %v2539_v31  ;;  %v239_v31 = vrot.slane %v222_v2, %v238_v28 }
  0xd9   :  { %2213 = vmatpush3.bf16.msra.mxu1 %v2554_v41 }
  0xda   :  { %2214 = vmatprep.subr.bf16.mxu1 %v2555_v46 }
  0xdb   :  { %2193 = vmatpush3.bf16.msra.mxu0 %v2540_v32 }
  0xdc   :  { %2194 = vmatprep.subr.bf16.mxu0 %v2541_v35 }
  0xdd   :  { %2215 = vmatpush3.bf16.msra.mxu1 %v2556_v47 }
  0xde   :  { %2216 = vmatprep.subr.bf16.mxu1 %v2557_v53 }
  0xdf   :  { %2195 = vmatpush3.bf16.msra.mxu0 %v2542_v36 }
  0xe0   :  { %2196 = vmatprep.subr.bf16.mxu0 %v2543_v37 }
  0xe1   :  { %2217 = vmatpush3.bf16.msra.mxu1 %v2558_v54 }
  0xe2   :  { %2218 = vmatprep.subr.bf16.mxu1 %v2559_v57 }
  0xe3   :  { %2197 = vmatpush3.bf16.msra.mxu0 %v2544_v38 }
  0xe4   :  { %2198 = vmatprep.subr.bf16.mxu0 %v2545_v39 }
  0xe5   :  { %2219 = vmatpush3.bf16.msra.mxu1 %v2560_v58 }
  0xe6   :  { %2220 = vmatprep.subr.bf16.mxu1 %v2561_v61 }
  0xe7   :  { %2199 = vmatpush3.bf16.msra.mxu0 %v2546_v40 }
  0xe9   :  { %2221 = vmatpush3.bf16.msra.mxu1 %v2562_v62 }
 0x102   :  { %v1286_v42 = vpop.f32.mrf.mxu0 }
 0x103   :  { %v1327_v43 = vpop.f32.mrf.mxu1  ;;  %v1287_v8 = vadd.f32 %v1286_v42, %v227_v4 }
 0x104   :  { %v1288_v44 = vpop.f32.mrf.mxu0 }
 0x105   :  { %v1329_v45 = vpop.f32.mrf.mxu1  ;;  %v1289_v9 = vadd.f32 %v1288_v44, %v231_v5  ;;  %v1328_v10 = vadd.f32 %v1327_v43, %v1287_v8 }
 0x106   :  { %v1290_v48 = vpop.f32.mrf.mxu0 }
 0x107   :  { %v1331_v49 = vpop.f32.mrf.mxu1  ;;  %v1330_v12 = vadd.f32 %v1329_v45, %v1289_v9 }
 0x108   :  { %v1291_v50 = vpop.f32.mrf.mxu0 }
 0x109   :  { %v1332_v52 = vpop.f32.mrf.mxu1 }
 0x10b   :  { %v1409_v55 = vpop.f32.mrf.mxu1 }
 0x10d   :  { %v1411_v56 = vpop.f32.mrf.mxu1 }
 0x10f   :  { %v1413_v59 = vpop.f32.mrf.mxu1 }
 0x110   :  { %v2151_v59 = vld [vmem:[%s3364_s4] ss:$0 sm:$0xff] }
 0x111   :  { %v1414_v60 = vpop.f32.mrf.mxu1 }
 0x142   :  { %v1368_v11 = vpop.f32.mrf.mxu0 }
 0x143   :  { %v1369_v15 = vadd.f32 %v1368_v11, %v1328_v10 }
 0x144   :  { %v1370_v16 = vpop.f32.mrf.mxu0 }
 0x145   :  { %v1410_v18 = vadd.f32 %v1409_v55, %v1369_v15  ;;  %v1371_v19 = vadd.f32 %v1370_v16, %v1330_v12 }
 0x146   :  { %v1372_v20 = vpop.f32.mrf.mxu0 }
 0x147   :  { %v1412_v21 = vadd.f32 %v1411_v56, %v1371_v19  ;;  %v1580_v22 = vmax.f32 %v1410_v18, 0.0 }
 0x148   :  { %v1373_v23 = vpop.f32.mrf.mxu0 }
 0x149   :  { %v1581_v24 = vmax.f32 %v1412_v21, 0.0  ;;  %v1584_v7 = vpack.c.bf16 %v1580_v22, %v1580_v22 }
 0x14b   :  { %v1450_v25 = vpop.f32.mrf.mxu1  ;;  %v1585_v26 = vpack.c.bf16 %v1581_v24, %v1581_v24 }
 0x14c   :  { %v1451_v32 = vadd.f32 %v1450_v25, %v235_v29 }
 0x14d   :  { %v1452_v13 = vpop.f32.mrf.mxu1  ;;  %1883 = vmatprep.mubr.bf16.mxu0 %v1585_v26 }
 0x14e   :  { %1884 = vmatmul.mubr.bf16.vlgmr.msra.gmra.mxu0 %v1584_v7  ;;  %v1453_v35 = vadd.f32 %v1452_v13, %v239_v31 }
 0x14f   :  { %v1454_v27 = vpop.f32.mrf.mxu1 }
 0x151   :  { %v1455_v14 = vpop.f32.mrf.mxu1 }
 0x182   :  { %v1491_v51 = vpop.f32.mrf.mxu0 }
 0x183   :  { %v1492_v33 = vadd.f32 %v1491_v51, %v1451_v32 }
 0x184   :  { %v1493_v30 = vpop.f32.mrf.mxu0 }
 0x185   :  { %v1494_v38 = vadd.f32 %v1493_v30, %v1453_v35 }
 0x186   :  { %v1495_v6 = vpop.f32.mrf.mxu0 }
 0x188   :  { %v1496_v34 = vpop.f32.mrf.mxu0 }
 0x18a   :  { %v1573_v37 = vpop.f32.mrf.mxu0 }
 0x18b   :  { %v1532_v36 = vpop.f32.mrf.mxu1 }
 0x18c   :  { %v1533_v39 = vadd.f32 %v1532_v36, %v1492_v33  ;;  %v1575_v41 = vpop.f32.mrf.mxu0 }
 0x18d   :  { %v1534_v40 = vpop.f32.mrf.mxu1 }
 0x18e   :  { %v1574_v42 = vadd.f32 %v1573_v37, %v1533_v39  ;;  %v1535_v43 = vadd.f32 %v1534_v40, %v1494_v38  ;;  %v1577_v45 = vpop.f32.mrf.mxu0 }
 0x18f   :  { %v1536_v44 = vpop.f32.mrf.mxu1 }
 0x190   :  { %v1576_v46 = vadd.f32 %v1575_v41, %v1535_v43  ;;  %v1582_v47 = vmax.f32 %v1574_v42, 0.0  ;;  %v1578_v49 = vpop.f32.mrf.mxu0 }
 0x191   :  { %v1537_v48 = vpop.f32.mrf.mxu1 }
 0x192   :  { %v1583_v50 = vmax.f32 %v1576_v46, 0.0  ;;  %v1586_v53 = vpack.c.bf16 %v1582_v47, %v1582_v47 }
 0x194   :  { %v1587_v52 = vpack.c.bf16 %v1583_v50, %v1583_v50 }
 0x196   :  { %1923 = vmatprep.mubr.bf16.mxu1 %v1587_v52 }
 0x197   :  { %1924 = vmatmul.mubr.bf16.vlgmr.msra.gmra.mxu1 %v1586_v53 }
 0x20e   :  { %v2200_v54 = vpop.f32.mrf.mxu0 }
 0x210   :  { %v2201_v55 = vpop.f32.mrf.mxu0 }
 0x211   :  { %v2202_v56 = vadd.f32 %v2201_v55, %v2200_v54 }
 0x212   :  { %v2203_v57 = vpop.f32.mrf.mxu0 }
 0x213   :  { %v1886_v62 = vadd.f32 %v2202_v56, %v2151_v59 }
 0x214   :  { %v2204_v58 = vpop.f32.mrf.mxu0 }
 0x257   :  { %v2222_v60 = vpop.f32.mrf.mxu1 }
 0x259   :  { %v2223_v61 = vpop.f32.mrf.mxu1 }
 0x25a   :  { %v2224_v63 = vadd.f32 %v2223_v61, %v2222_v60 }
 0x25b   :  { %v2225_v0 = vpop.f32.mrf.mxu1 }
 0x25c   :  { %v1926_v1 = vadd.f32 %v2224_v63, %v1886_v62 }
 0x25d   :  { %v2226_v2 = vpop.f32.mrf.mxu1 }
 0x25e   :  { %1931 = vst [vmem:[#allocation2] sm:$0xff] %v1926_v1 }
 0x25f   :  { %2574 = shalt.err (!%p2571_p4)
}
 0x260   :  { %1941 = dma.vmem_to_hbm [thread:$0]  %s1939_s21, 128, %s3365_s5, [#allocation3]  }
 0x261   :  { %2583 = dma.done.wait [#allocation3], 128  }
 0x262   :  { %2584 = vsyncadd [#allocation3], 4294967168 }
 0x263   :  { %1945 = vsyncpa [#allocation3], 1 }

</bundles_post_ra>
